<compile_context>
chip_gen: v6e
topology: v6e:2x2x1
jax: 0.10.0
libtpu: 0.0.40
codegen_flags: <defaults>
</compile_context>

<pallas_src>
import functools

import jax
import jax.numpy as jnp
from jax.experimental import pallas as pl
from jax.experimental.pallas import tpu as pltpu

L1_OUT = 64
L2_OUT = 32

# Conservative in-kernel VMEM budget (double-buffered x/out tiles + f32/bf16
# intermediates).  16 MiB keeps comfortable headroom under v7x's 32 MiB scoped
# default; v5e/v6e (128 MiB) trivially fit.
_VMEM_BUDGET_BYTES = 16 * 1024 * 1024


def _cdiv(a, m):
    return (a + m - 1) // m


def _round_up(a, m):
    return _cdiv(a, m) * m


def _round_down(a, m):
    return (a // m) * m


def _default_act_dtype():
    """bf16 tanh on chips with a bf16 EUP/VPU (v6e, v7x); f32 elsewhere."""
    try:
        kind = jax.devices()[0].device_kind.lower()
    except Exception:  # pragma: no cover - defensive
        return jnp.float32
    if "v6" in kind or "v7" in kind:
        return jnp.bfloat16
    return jnp.float32


def _choose_tile_b(B, n_in, n_out, l1, l2, tile_b):
    """Pick a lane tile: multiple of 128, VMEM-capped, >=2 grid steps if possible."""
    per_lane_bytes = (
        2 * n_in * 2        # x tile, bf16, double-buffered
        + 2 * n_out * 4     # out tile, f32, double-buffered
        + l1 * 6            # h1 in f32 + bf16
        + l2 * 6            # h2 in f32 + bf16
    )
    vmem_cap = max(128, _round_down(_VMEM_BUDGET_BYTES // per_lane_bytes, 128))
    tb = max(128, _round_down(min(tile_b, vmem_cap), 128))
    n128 = _cdiv(B, 128)
    if n128 >= 2:
        # Keep at least 2 grid steps so v7x's two TensorCores both get work.
        tb = min(tb, _cdiv(n128, 2) * 128)
    tb = min(tb, n128 * 128)
    return tb


def _mlp_kernel(x_ref, w1_ref, w2_ref, w3_ref, b_ref, o_ref, *, act_dtype):
    l1 = w1_ref.shape[0]
    l2 = w2_ref.shape[0]
    n_out = w3_ref.shape[0]

    # Fused bias vector: rows [0:l1) -> b1, [l1:l1+l2) -> b2, rest -> b3 (f32).
    b1 = b_ref[0:l1, :]
    b2 = b_ref[l1:l1 + l2, :]
    b3 = b_ref[l1 + l2:l1 + l2 + n_out, :]

    xT = x_ref[...]                                        # (n_in, TILE_B) bf16
    # Layer 1 (MXU bf16 x bf16 -> f32) + tanh (bf16 EUP on v6e/v7x, f32 on v5e).
    h1 = jnp.dot(w1_ref[...], xT, preferred_element_type=jnp.float32)
    h1 = jnp.tanh((h1 + b1).astype(act_dtype))
    # Layer 2 + tanh.
    h2 = jnp.dot(w2_ref[...], h1.astype(w2_ref.dtype),
                 preferred_element_type=jnp.float32)
    h2 = jnp.tanh((h2 + b2).astype(act_dtype))
    # Layer 3 (no activation).  Lane-dense (n_out, TILE_B) store.
    y = jnp.dot(w3_ref[...], h2.astype(w3_ref.dtype),
                preferred_element_type=jnp.float32) + b3
    o_ref[...] = y.astype(o_ref.dtype)


def net_forward_t(xT, params, *, tile_b=16384, act_dtype=None,
                  out_dtype=jnp.float32, compute_dtype=jnp.bfloat16):
    """Kernel-native layout: xT is [n_inputs, B]; returns [n_outputs, B]."""
    w1, b1, w2, b2, w3, b3 = params            # W: [out, in], b: [out]
    n_in, B = xT.shape
    l1, l2, n_out = w1.shape[0], w2.shape[0], w3.shape[0]
    if act_dtype is None:
        act_dtype = _default_act_dtype()

    tb = _choose_tile_b(B, n_in, n_out, l1, l2, tile_b)
    b_pad = _round_up(B, tb)

    # Layout plumbing (fused by XLA).  Pad only when B is not a tile multiple.
    xT = xT.astype(compute_dtype)
    if b_pad != B:
        xT = jnp.pad(xT, ((0, 0), (0, b_pad - B)))
    w1c = w1.astype(compute_dtype)
    w2c = w2.astype(compute_dtype)
    w3c = w3.astype(compute_dtype)
    b_all = jnp.concatenate(
        [b1.reshape(l1, 1), b2.reshape(l2, 1), b3.reshape(n_out, 1)], axis=0
    ).astype(jnp.float32)

    flops = 2 * b_pad * (n_in * l1 + l1 * l2 + l2 * n_out)
    transcendentals = (l1 + l2) * b_pad
    bytes_accessed = (n_in * b_pad * 2
                      + n_out * b_pad * jnp.dtype(out_dtype).itemsize
                      + (l1 * n_in + l2 * l1 + n_out * l2) * 2
                      + (l1 + l2 + n_out) * 4)

    kernel = functools.partial(_mlp_kernel, act_dtype=act_dtype)

    yT = pl.pallas_call(
        kernel,
        out_shape=jax.ShapeDtypeStruct((n_out, b_pad), out_dtype),
        grid=(b_pad // tb,),
        in_specs=[
            pl.BlockSpec((n_in, tb), lambda i: (0, i)),            # xT (tiled)
            pl.BlockSpec((l1, n_in), lambda i: (0, 0)),            # W1 (resident)
            pl.BlockSpec((l2, l1), lambda i: (0, 0)),              # W2 (resident)
            pl.BlockSpec((n_out, l2), lambda i: (0, 0)),           # W3 (resident)
            pl.BlockSpec((l1 + l2 + n_out, 1), lambda i: (0, 0)),  # fused biases
        ],
        out_specs=pl.BlockSpec((n_out, tb), lambda i: (0, i)),
        compiler_params=pltpu.CompilerParams(
            dimension_semantics=("parallel",),  # shard batch grid across TCs (v7x)
        ),
        cost_estimate=pl.CostEstimate(
            flops=flops,
            transcendentals=transcendentals,
            bytes_accessed=bytes_accessed,
        ),
    )(xT, w1c, w2c, w3c, b_all)

    if b_pad != B:
        yT = yT[:, :B]
    return yT


def net_forward(x, params, **kwargs):
    """PyTorch-convention wrapper: x is [B, n_inputs]; returns [B, n_outputs]."""
    yT = net_forward_t(jnp.swapaxes(x, 0, 1), params, **kwargs)
    return jnp.swapaxes(yT, 0, 1)


def init_params(key, n_inputs, n_outputs):
    """nn.Linear-style init: W [out, in], b [out], U(-1/sqrt(fan_in), +)."""
    dims = [(n_inputs, L1_OUT), (L1_OUT, L2_OUT), (L2_OUT, n_outputs)]
    params = []
    for fan_in, fan_out in dims:
        key, kw, kb = jax.random.split(key, 3)
        bound = 1.0 / jnp.sqrt(jnp.float32(fan_in))
        w = jax.random.uniform(kw, (fan_out, fan_in), jnp.float32, -bound, bound)
        b = jax.random.uniform(kb, (fan_out,), jnp.float32, -bound, bound)
        params.extend([w, b])
    return tuple(params)


def reference_forward_f32(x, params):
    """Pure-f32 reference matching the PyTorch module semantics exactly."""
    w1, b1, w2, b2, w3, b3 = params
    h = jnp.tanh(x @ w1.T + b1)
    h = jnp.tanh(h @ w2.T + b2)
    return h @ w3.T + b3


def reference_forward_matched(x, params, *, compute_dtype=jnp.bfloat16,
                              act_dtype=jnp.float32):
    """Reference applying the same dtype transforms as the kernel."""
    w1, b1, w2, b2, w3, b3 = params
    xT = jnp.swapaxes(x, 0, 1).astype(compute_dtype)
    h = jnp.dot(w1.astype(compute_dtype), xT, preferred_element_type=jnp.float32)
    h = jnp.tanh((h + b1[:, None]).astype(act_dtype))
    h = jnp.dot(w2.astype(compute_dtype), h.astype(compute_dtype),
                preferred_element_type=jnp.float32)
    h = jnp.tanh((h + b2[:, None]).astype(act_dtype))
    y = jnp.dot(w3.astype(compute_dtype), h.astype(compute_dtype),
                preferred_element_type=jnp.float32) + b3[:, None]
    return jnp.swapaxes(y, 0, 1)


if __name__ == "__main__":
    n_inputs, n_outputs, batch = 8, 4, 2
    key = jax.random.PRNGKey(0)
    key, kx = jax.random.split(key)
    x = jax.random.normal(kx, (batch, n_inputs), jnp.float32)
    params = init_params(key, n_inputs, n_outputs)

    fwd = jax.jit(net_forward)
    y = fwd(x, params)
    jax.block_until_ready(y)
    assert y.shape == (batch, n_outputs)

    act_dtype = _default_act_dtype()
    y_matched = reference_forward_matched(x, params, act_dtype=act_dtype)
    y_f32 = reference_forward_f32(x, params)
    tol_matched = 2e-3 if act_dtype == jnp.float32 else 2e-2
    assert jnp.allclose(y, y_matched, atol=tol_matched, rtol=tol_matched), \
        "mismatch vs. dtype-matched reference"
    assert jnp.allclose(y, y_f32, atol=5e-2, rtol=5e-2), \
        "mismatch vs. f32 reference"

    # Second check: a batch that exercises a multi-step grid (>=2 tiles,
    # non-multiple-of-128 padding path).
    batch2 = 300
    key, kx2 = jax.random.split(key)
    x2 = jax.random.normal(kx2, (batch2, n_inputs), jnp.float32)
    y2 = fwd(x2, params)
    jax.block_until_ready(y2)
    assert y2.shape == (batch2, n_outputs)
    assert jnp.allclose(y2, reference_forward_f32(x2, params),
                        atol=5e-2, rtol=5e-2), "mismatch (batch=300)"

    print("KERNEL_OK")
</pallas_src>

<mosaic_0001>
module attributes {stable_mosaic.version = 11 : i64} {
  func.func @_mlp_kernel(%arg0: i32, %arg1: memref<8x128xbf16, #tpu.memory_space<vmem>>, %arg2: memref<64x8xbf16, #tpu.memory_space<vmem>>, %arg3: memref<32x64xbf16, #tpu.memory_space<vmem>>, %arg4: memref<4x32xbf16, #tpu.memory_space<vmem>>, %arg5: memref<100x1xf32, #tpu.memory_space<vmem>>, %arg6: memref<4x128xf32, #tpu.memory_space<vmem>>) attributes {dimension_semantics = [#tpu.dimension_semantics<parallel>], iteration_bounds = array<i64: 1>, scalar_prefetch = 0 : i64, scratch_operands = 0 : i64, tpu.core_type = #tpu.core_type<tc>, window_params = [{transform_indices = @transform_0, window_bounds = array<i64: 8, 128>}, {pipeline_mode = #tpu.pipeline_mode<synchronous>, transform_indices = @transform_1, window_bounds = array<i64: 64, 8>}, {pipeline_mode = #tpu.pipeline_mode<synchronous>, transform_indices = @transform_2, window_bounds = array<i64: 32, 64>}, {pipeline_mode = #tpu.pipeline_mode<synchronous>, transform_indices = @transform_3, window_bounds = array<i64: 4, 32>}, {pipeline_mode = #tpu.pipeline_mode<synchronous>, transform_indices = @transform_4, window_bounds = array<i64: 100, 1>}, {transform_indices = @transform_5, window_bounds = array<i64: 4, 128>}]} {
    %c0 = arith.constant 0 : index
    %c0_0 = arith.constant 0 : index
    %0 = vector.load %arg5[%c0, %c0_0] : memref<100x1xf32, #tpu.memory_space<vmem>>, vector<64x1xf32>
    %c64 = arith.constant 64 : index
    %c0_1 = arith.constant 0 : index
    %1 = vector.load %arg5[%c64, %c0_1] : memref<100x1xf32, #tpu.memory_space<vmem>>, vector<32x1xf32>
    %c96 = arith.constant 96 : index
    %c0_2 = arith.constant 0 : index
    %2 = vector.load %arg5[%c96, %c0_2] : memref<100x1xf32, #tpu.memory_space<vmem>>, vector<4x1xf32>
    %c0_3 = arith.constant 0 : index
    %c0_4 = arith.constant 0 : index
    %3 = vector.load %arg1[%c0_3, %c0_4] : memref<8x128xbf16, #tpu.memory_space<vmem>>, vector<8x128xbf16>
    %c0_5 = arith.constant 0 : index
    %c0_6 = arith.constant 0 : index
    %4 = vector.load %arg2[%c0_5, %c0_6] : memref<64x8xbf16, #tpu.memory_space<vmem>>, vector<64x8xbf16>
    %cst = arith.constant dense<0.000000e+00> : vector<64x128xf32>
    %5 = tpu.matmul %4, %3, %cst {dimension_numbers = #tpu.dot_dimension_numbers<[1], [0], [0], [1], [0, 0, 1, 1], [], []>} : vector<64x8xbf16>, vector<8x128xbf16>, vector<64x128xf32> -> vector<64x128xf32>
    %6 = vector.broadcast %0 : vector<64x1xf32> to vector<64x128xf32>
    %7 = arith.addf %5, %6 : vector<64x128xf32>
    %8 = math.tanh %7 : vector<64x128xf32>
    %c0_7 = arith.constant 0 : index
    %c0_8 = arith.constant 0 : index
    %9 = vector.load %arg3[%c0_7, %c0_8] : memref<32x64xbf16, #tpu.memory_space<vmem>>, vector<32x64xbf16>
    %10 = arith.truncf %8 : vector<64x128xf32> to vector<64x128xbf16>
    %cst_9 = arith.constant dense<0.000000e+00> : vector<32x128xf32>
    %11 = tpu.matmul %9, %10, %cst_9 {dimension_numbers = #tpu.dot_dimension_numbers<[1], [0], [0], [1], [0, 0, 1, 1], [], []>} : vector<32x64xbf16>, vector<64x128xbf16>, vector<32x128xf32> -> vector<32x128xf32>
    %12 = vector.broadcast %1 : vector<32x1xf32> to vector<32x128xf32>
    %13 = arith.addf %11, %12 : vector<32x128xf32>
    %14 = math.tanh %13 : vector<32x128xf32>
    %c0_10 = arith.constant 0 : index
    %c0_11 = arith.constant 0 : index
    %15 = vector.load %arg4[%c0_10, %c0_11] : memref<4x32xbf16, #tpu.memory_space<vmem>>, vector<4x32xbf16>
    %16 = arith.truncf %14 : vector<32x128xf32> to vector<32x128xbf16>
    %cst_12 = arith.constant dense<0.000000e+00> : vector<4x128xf32>
    %17 = tpu.matmul %15, %16, %cst_12 {dimension_numbers = #tpu.dot_dimension_numbers<[1], [0], [0], [1], [0, 0, 1, 1], [], []>} : vector<4x32xbf16>, vector<32x128xbf16>, vector<4x128xf32> -> vector<4x128xf32>
    %18 = vector.broadcast %2 : vector<4x1xf32> to vector<4x128xf32>
    %19 = arith.addf %17, %18 : vector<4x128xf32>
    %c0_13 = arith.constant 0 : index
    %c0_14 = arith.constant 0 : index
    %20 = vector.load %arg6[%c0_13, %c0_14] : memref<4x128xf32, #tpu.memory_space<vmem>>, vector<4x128xf32>
    tpu.vector_store %arg6[%c0_13, %c0_14], %19 {strides = array<i32>} : memref<4x128xf32, #tpu.memory_space<vmem>>, vector<4x128xf32>,
    return
  }
  func.func @transform_0(%arg0: i32) -> (i32, i32) {
    %c0_i32 = arith.constant 0 : i32
    %c0_i32_0 = arith.constant 0 : i32
    return %c0_i32, %arg0 : i32, i32
  }
  func.func @transform_1(%arg0: i32) -> (i32, i32) {
    %c0_i32 = arith.constant 0 : i32
    %c0_i32_0 = arith.constant 0 : i32
    %c0_i32_1 = arith.constant 0 : i32
    return %c0_i32, %c0_i32_0 : i32, i32
  }
  func.func @transform_2(%arg0: i32) -> (i32, i32) {
    %c0_i32 = arith.constant 0 : i32
    %c0_i32_0 = arith.constant 0 : i32
    %c0_i32_1 = arith.constant 0 : i32
    return %c0_i32, %c0_i32_0 : i32, i32
  }
  func.func @transform_3(%arg0: i32) -> (i32, i32) {
    %c0_i32 = arith.constant 0 : i32
    %c0_i32_0 = arith.constant 0 : i32
    %c0_i32_1 = arith.constant 0 : i32
    return %c0_i32, %c0_i32_0 : i32, i32
  }
  func.func @transform_4(%arg0: i32) -> (i32, i32) {
    %c0_i32 = arith.constant 0 : i32
    %c0_i32_0 = arith.constant 0 : i32
    %c0_i32_1 = arith.constant 0 : i32
    return %c0_i32, %c0_i32_0 : i32, i32
  }
  func.func @transform_5(%arg0: i32) -> (i32, i32) {
    %c0_i32 = arith.constant 0 : i32
    %c0_i32_0 = arith.constant 0 : i32
    return %c0_i32, %arg0 : i32, i32
  }
}

</mosaic_0001>

<bundles_post_ra>
// kernel: net_forward.1
= control target key start
LH: loop header
LB: loop body
LE: loop exit
PB: predicated region body
PF: predicated region fallthrough
CT: control target
= control target key end

     0   :  { %vm116_vm0 = vcmask 1043456   ;;  %vm103_vm1 = vcmask 64512   ;;  %v441_v1 = vmov 0   ;;  %vm231_vm2 = vcmask 523264   ;;  %s546_s0 = inlined_call_operand.vmem [shape: bf16[8,128], index: 0, kind: input, shape index: {}]   ;;  %s547_s1 = inlined_call_operand.vmem [shape: bf16[64,8], index: 1, kind: input, shape index: {}]   ;;  %s548_s4 = inlined_call_operand.vmem [shape: f32[100,1], index: 4, kind: input, shape index: {}]   ;;  %s549_s2 = inlined_call_operand.vmem [shape: bf16[32,64], index: 2, kind: input, shape index: {}]   ;;  %s550_s3 = inlined_call_operand.vmem [shape: bf16[4,32], index: 3, kind: input, shape index: {}]   ;;  %s551_s5 = inlined_call_operand.vmem [shape: f32[4,128], index: 5, kind: output, shape index: {}]  }
   0x1   :  { %v34_v0 = vld [vmem:[%s546_s0] sm:$0xf]  ;;  %409 = vset.pattern.permute.xlu0 %v441_v1  ;;  %410 = vset.pattern.permute.xlu1 %v441_v1  ;;  %v412_v4 = vld [vmem:[%s547_s1 + $0x8] sm:$0xff]   ;;  %v413_v5 = vld [vmem:[%s547_s1 + $0x10] sm:$0xff]   ;;  %v442_v58 = vmov 0.0   ;;  %vm443_vm3 = vmmov 0  }
   0x2   :  { %405 = vmatprep.subr.msk.bf16.mxu0 %vm116_vm0, %v34_v0  ;;  %v118_v2 = vsel %vm116_vm0, %v34_v0, 0  ;;  %v411_v3 = vld [vmem:[%s547_s1] sm:$0xff]   ;;  %v27_v6 = vld [vmem:[%s548_s4 + $0x30] sm:$0xff]  ;;  %v28_v8 = vld [vmem:[%s548_s4 + $0x38] sm:$0xff]  ;;  %vm299_vm4 = vcmask 261120  }
   0x3   :  { %376 = vmatpush3.bf16.msra.mxu0 %v118_v2  ;;  %377 = vmatprep.mubr.msk.bf16.mxu0 %vm103_vm1, %v411_v3  ;;  %v25_v7 = vld [vmem:[%s548_s4 + $0x20] sm:$0xff]  ;;  %v26_v9 = vld [vmem:[%s548_s4 + $0x28] sm:$0xff]  ;;  %v414_v10 = vld [vmem:[%s547_s1 + $0x18] sm:$0xff]  }
   0x4   :  { %75 = vperm.xlu0 %409, %v27_v6   ;;  %65 = vperm.xlu1 %410, %v25_v7   ;;  %v23_v11 = vld [vmem:[%s548_s4 + $0x10] sm:$0xff]  ;;  %v24_v12 = vld [vmem:[%s548_s4 + $0x18] sm:$0xff]  ;;  %v21_v13 = vld [vmem:[%s548_s4] sm:$0xff] }
   0x5   :  { %v22_v14 = vld [vmem:[%s548_s4 + $0x8] sm:$0xff]  ;;  %v31_v15 = vld [vmem:[%s548_s4 + $0x50] sm:$0xff]  ;;  %v32_v16 = vld [vmem:[%s548_s4 + $0x58] sm:$0xff]  ;;  %397 = vmatprep.subr.bf16.mxu0 %v442_v58 }
   0x6   :  { %378 = vmatmul.mubr.msk.bf16.vlgmr.msra.gmra.mxu0 %vm103_vm1, %v412_v4  ;;  %v29_v17 = vld [vmem:[%s548_s4 + $0x40] sm:$0xff]  ;;  %v30_v18 = vld [vmem:[%s548_s4 + $0x48] sm:$0xff] }
   0x7   :  { %381 = vmatprep.mubr.msk.bf16.mxu0 %vm103_vm1, %v413_v5  ;;  %v33_v19 = vld [vmem:[%s548_s4 + $0x60] sm:$0xf]  ;;  %v416_v57 = vld [vmem:[%s549_s2 + $0x8] sm:$0xff]  }
   0x8   :  { %80 = vperm.xlu0 %409, %v28_v8   ;;  %70 = vperm.xlu1 %410, %v26_v9   ;;  %v415_v20 = vld [vmem:[%s549_s2] sm:$0xff]  }
   0x9   :  { %393 = vmatprep.mubr.msk.bf16.mxu1 %vm231_vm2, %v415_v20 }
   0xc   :  { %55 = vperm.xlu0 %409, %v23_v11   ;;  %60 = vperm.xlu1 %410, %v24_v12  }
   0xe   :  { %382 = vmatmul.mubr.msk.bf16.gmra.mxu0 %vm103_vm1, %v414_v10 }
   0xf   :  { %401 = vmatprep.mubr.msk.bf16.mxu0 %vm443_vm3, %v442_v58 }
  0x10   :  { %45 = vperm.xlu0 %409, %v21_v13   ;;  %50 = vperm.xlu1 %410, %v22_v14   ;;  %v291_v13 = vld [vmem:[%s550_s3] sm:$0x3] }
  0x14   :  { %213 = vperm.xlu0 %409, %v31_v15   ;;  %218 = vperm.xlu1 %410, %v32_v16  }
  0x18   :  { %203 = vperm.xlu0 %409, %v29_v17   ;;  %208 = vperm.xlu1 %410, %v30_v18  }
  0x1c   :  { %296 = vperm.xlu0 %409, %v33_v19  }
  0x7f   :  { %v66_v21 = vpop.permute.xlu1 %65  ;;  %v76_v23 = vpop.permute.xlu0 %75 }
  0x83   :  { %v71_v26 = vpop.permute.xlu1 %70  ;;  %v81_v28 = vpop.permute.xlu0 %80 }
  0x87   :  { %v61_v32 = vpop.permute.xlu1 %60  ;;  %v56_v36 = vpop.permute.xlu0 %55 }
  0x8b   :  { %v51_v41 = vpop.permute.xlu1 %50  ;;  %v46_v43 = vpop.permute.xlu0 %45 }
  0x8f   :  { %v214_v59 = vpop.permute.xlu0 %213  ;;  %v219_v60 = vpop.permute.xlu1 %218 }
  0x93   :  { %v204_v1 = vpop.permute.xlu0 %203  ;;  %v209_v3 = vpop.permute.xlu1 %208 }
  0x97   :  { %v297_v14 = vpop.permute.xlu0 %296 }
  0xc6   :  { %v379_v22 = vpop.f32.mrf.mxu0 }
  0xc7   :  { %v163_v40 = vadd.f32 %v379_v22, %v56_v36 }
  0xc8   :  { %v154_v24 = vpop.f32.mrf.mxu0 }
  0xc9   :  { %v155_v44 = vadd.f32 %v154_v24, %v46_v43 }
  0xca   :  { %v380_v25 = vpop.f32.mrf.mxu0 }
  0xcb   :  { %v166_v38 = vadd.f32 %v380_v25, %v61_v32 }
  0xcc   :  { %v157_v27 = vpop.f32.mrf.mxu0 }
  0xcd   :  { %v158_v42 = vadd.f32 %v157_v27, %v51_v41 }
  0xce   :  { %v383_v29 = vpop.f32.mrf.mxu0 }
  0xcf   :  { %v179_v30 = vadd.f32 %v383_v29, %v76_v23 }
  0xd0   :  { %v170_v31 = vpop.f32.mrf.mxu0 }
  0xd1   :  { %v171_v33 = vadd.f32 %v170_v31, %v66_v21  ;;  %417 = vtanh.f32 %v179_v30 }
  0xd2   :  { %v384_v34 = vpop.f32.mrf.mxu0 }
  0xd3   :  { %v182_v35 = vadd.f32 %v384_v34, %v81_v28 }
  0xd4   :  { %v173_v37 = vpop.f32.mrf.mxu0 }
  0xd5   :  { %419 = vtanh.f32 %v182_v35  ;;  %v174_v39 = vadd.f32 %v173_v37, %v71_v26 }
  0xd6   :  { %421 = vtanh.f32 %v171_v33 }
  0xd7   :  { %423 = vtanh.f32 %v174_v39 }
  0xd8   :  { %425 = vtanh.f32 %v166_v38 }
  0xd9   :  { %427 = vtanh.f32 %v163_v40 }
  0xda   :  { %429 = vtanh.f32 %v158_v42 }
  0xdb   :  { %431 = vtanh.f32 %v155_v44 }
  0xde   :  { %v418_v45 = vpop.eup %417 }
  0xe2   :  { %v420_v46 = vpop.eup %419 }
  0xe3   :  { %v422_v47 = vpop.eup %421  ;;  %v200_v48 = vpack.c.bf16 %v420_v46, %v418_v45 }
  0xe4   :  { %v424_v49 = vpop.eup %423 }
  0xe5   :  { %385 = vmatprep.subr.bf16.mxu1 %v200_v48  ;;  %v199_v50 = vpack.c.bf16 %v424_v49, %v422_v47  ;;  %v426_v51 = vpop.eup %425 }
  0xe6   :  { %386 = vmatpush3.bf16.msra.mxu1 %v200_v48  ;;  %v428_v52 = vpop.eup %427 }
  0xe7   :  { %387 = vmatprep.subr.bf16.mxu1 %v199_v50  ;;  %v198_v53 = vpack.c.bf16 %v426_v51, %v428_v52  ;;  %v430_v54 = vpop.eup %429 }
  0xe8   :  { %v432_v55 = vpop.eup %431 }
  0xe9   :  { %v197_v56 = vpack.c.bf16 %v430_v54, %v432_v55 }
  0xea   :  { %388 = vmatpush3.bf16.msra.mxu1 %v199_v50 }
  0xeb   :  { %389 = vmatprep.subr.bf16.mxu1 %v198_v53 }
  0xee   :  { %390 = vmatpush3.bf16.msra.mxu1 %v198_v53 }
  0xef   :  { %391 = vmatprep.subr.bf16.mxu1 %v197_v56 }
  0xf2   :  { %392 = vmatpush3.bf16.msra.mxu1 %v197_v56 }
  0xf5   :  { %394 = vmatmul.mubr.msk.bf16.vlgmr.msra.gmra.mxu1 %vm231_vm2, %v416_v57 }
 0x1b5   :  { %v395_v61 = vpop.f32.mrf.mxu1 }
 0x1b6   :  { %v281_v62 = vadd.f32 %v395_v61, %v214_v59 }
 0x1b7   :  { %v272_v63 = vpop.f32.mrf.mxu1 }
 0x1b8   :  { %433 = vtanh.f32 %v281_v62  ;;  %v273_v5 = vadd.f32 %v272_v63, %v204_v1 }
 0x1b9   :  { %v396_v0 = vpop.f32.mrf.mxu1 }
 0x1ba   :  { %v284_v2 = vadd.f32 %v396_v0, %v219_v60 }
 0x1bb   :  { %v275_v4 = vpop.f32.mrf.mxu1 }
 0x1bc   :  { %435 = vtanh.f32 %v284_v2  ;;  %v276_v6 = vadd.f32 %v275_v4, %v209_v3 }
 0x1be   :  { %437 = vtanh.f32 %v276_v6 }
 0x1bf   :  { %439 = vtanh.f32 %v273_v5 }
 0x1c5   :  { %v434_v7 = vpop.eup %433 }
 0x1c9   :  { %v436_v8 = vpop.eup %435 }
 0x1ca   :  { %v293_v9 = vpack.c.bf16 %v436_v8, %v434_v7 }
 0x1cb   :  { %v438_v10 = vpop.eup %437 }
 0x1cc   :  { %398 = vmatpush3.bf16.msra.mxu0 %v293_v9  ;;  %v440_v11 = vpop.eup %439 }
 0x1cd   :  { %399 = vmatprep.subr.bf16.mxu0 %v442_v58  ;;  %v292_v12 = vpack.c.bf16 %v438_v10, %v440_v11 }
 0x1d0   :  { %400 = vmatpush3.bf16.msra.mxu0 %v292_v12 }
 0x1d3   :  { %402 = vmatmul.mubr.msk.bf16.vlgmr.msra.gmra.mxu0 %vm299_vm4, %v291_v13 }
 0x293   :  { %v337_v15 = vpop.f32.mrf.mxu0 }
 0x294   :  { %v338_v16 = vadd.f32 %v337_v15, %v297_v14 }
 0x295   :  { %v403_v17 = vpop.f32.mrf.mxu0 }
 0x296   :  { %343 = vst [vmem:[%s551_s5] sm:$0xf] %v338_v16 }
 0x297   :  { %v340_v18 = vpop.f32.mrf.mxu0 }
 0x299   :  { %v404_v19 = vpop.f32.mrf.mxu0 }

</bundles_post_ra>
